<compile_context>
chip_gen: v7x
topology: tpu7x:2x2x1
jax: 0.10.0
libtpu: 0.0.40
codegen_flags: <defaults>
</compile_context>

<pallas_src>
import math
from functools import partial

import jax
import jax.numpy as jnp
import numpy as np
from jax.experimental import pallas as pl
from jax.experimental.pallas import tpu as pltpu


def _sparse_attention_kernel(q_ref, k_ref, v_ref, o_ref, *,
                             topk, compute_dtype, approx_recip):
    g, q_tile, head_dim = q_ref.shape          # (g, Tq, hd)
    seq_len = k_ref.shape[1]                   # (g, S, hd)
    qi = pl.program_id(2)

    Tq, S = q_tile, seq_len
    kk = min(topk, S)
    neg_inf = jnp.float32(-jnp.inf)
    scale = jnp.float32(1.0 / math.sqrt(head_dim))

    # Row/col indices, causal mask and the "first kk rows" fill are
    # head-independent -> hoisted out of the per-head loop.
    row = qi * Tq + jax.lax.broadcasted_iota(jnp.int32, (Tq, S), 0)
    col = jax.lax.broadcasted_iota(jnp.int32, (Tq, S), 1)
    causal = col <= row
    # Rows with fewer than kk valid columns: torch.topk / lax.top_k break -inf
    # ties by lowest index, i.e. such rows select exactly columns 0..kk-1.
    first_rows_fill = jnp.logical_and(row < kk, col < kk)

    def knock_once(c):
        # One XLU max-reduction + one compare + one select per selected item;
        # carries a single (Tq, S) buffer.
        return jnp.where(c == jnp.max(c, axis=-1, keepdims=True), neg_inf, c)

    head_outs = []
    for h in range(g):
        qh = q_ref[h]                                   # (Tq, hd)
        kh = k_ref[h]                                   # (S,  hd)
        vh = v_ref[h]                                   # (S,  hd)

        # scores = q @ k^T / sqrt(hd) (contract on hd; MXU, f32 accumulation).
        s = jax.lax.dot_general(qh, kh, (((1,), (1,)), ((), ())),
                                preferred_element_type=jnp.float32)
        s = jnp.where(causal, s * scale, neg_inf)       # (Tq, S)

        # Iterative top-k knockout.
        if kk <= 16:                                    # fully unrolled
            cand = s
            for _ in range(kk):
                cand = knock_once(cand)
        else:
            cand = jax.lax.fori_loop(0, kk, lambda i, c: knock_once(c), s,
                                     unroll=4)

        # Derive the selection mask after the loop (no per-step bookkeeping).
        selected = jnp.logical_and(cand == neg_inf, causal)
        selected = jnp.logical_or(selected, first_rows_fill)

        # Scatter-into-zeros + softmax over the FULL row: unselected columns
        # keep value 0 (weight exp(0-m)); selected -inf columns contribute 0.
        sparse = jnp.where(selected, s, jnp.float32(0.0))
        m = jnp.max(sparse, axis=-1, keepdims=True)
        e = jnp.exp(sparse - m)
        attn = e * pl.reciprocal(jnp.sum(e, axis=-1, keepdims=True),
                                 approx=approx_recip)

        head_outs.append(jnp.dot(attn.astype(compute_dtype), vh,
                                 preferred_element_type=jnp.float32))

    # Single lane-dense store of the head-group output block (Tq, g*hd).
    o_ref[...] = jnp.concatenate(head_outs, axis=-1).astype(o_ref.dtype)


def _round_up(x, m):
    return -(-x // m) * m


def _vmem_capacity_bytes():
    """Best-effort VMEM capacity query; conservative fallback of 128 MiB."""
    default = 128 * 1024 * 1024
    try:
        info = pltpu.get_tpu_info()
    except Exception:
        return default
    for name in ("vmem_capacity_bytes", "vmem_bytes", "vmem_size_bytes"):
        cap = getattr(info, name, None)
        if isinstance(cap, (int, np.integer)) and cap > 0:
            return int(cap)
    return default


def _pick_head_group(n_heads, head_dim):
    """Smallest divisor g of n_heads with lane-dense output blocks
    (g*head_dim % 128 == 0); falls back to all heads (block == full D)."""
    for g in range(1, n_heads + 1):
        if n_heads % g == 0 and (g * head_dim) % 128 == 0:
            return g
    return n_heads


def _q_tiling(seq_len, target):
    """Return (tile, n_tiles, padded_len); pads the q axis instead of
    un-tiling when seq_len is not a multiple of the tile."""
    target = max(8, _round_up(target, 8))
    if seq_len <= target:
        tq = _round_up(seq_len, 8)
        return tq, 1, tq
    n_q = -(-seq_len // target)
    return target, n_q, n_q * target


def sparse_attention(x, wq, wk, wv, wo, *, n_heads, topk,
                     compute_dtype=jnp.bfloat16, q_tile=None, head_group=None):
    """SparseAttention forward (eval mode, use_block=False).

    Assumes n_kv_heads == n_heads (the reference forward requires it).
    Weights are (in_features, out_features), i.e. already transposed from the
    PyTorch nn.Linear layout.
    """
    B, S, D = x.shape
    assert D % n_heads == 0
    hd = D // n_heads
    out_dtype = x.dtype
    cd = compute_dtype

    vmem_cap = _vmem_capacity_bytes()
    vmem_limit = int(min(64 * 1024 * 1024, (vmem_cap * 3) // 4))   # 48 MiB on v7x
    if q_tile is None:
        q_tile = 256 if vmem_cap >= 96 * 1024 * 1024 else 128

    Tq, n_q, S_pad = _q_tiling(S, q_tile)
    g = head_group if head_group is not None else _pick_head_group(n_heads, hd)
    assert n_heads % g == 0
    n_hg = n_heads // g

    # Hoisted Q/K/V projections (plain XLA matmuls), laid out (B, H, S, hd).
    def proj(w):
        return (x @ w).reshape(B, S, n_heads, hd).transpose(0, 2, 1, 3)

    q = proj(wq).astype(cd)
    k = proj(wk).astype(cd)
    v = proj(wv).astype(cd)
    if S_pad != S:
        q = jnp.pad(q, ((0, 0), (0, 0), (0, S_pad - S), (0, 0)))

    kernel = partial(_sparse_attention_kernel, topk=topk, compute_dtype=cd,
                     approx_recip=bool(np.dtype(cd) != np.dtype(jnp.float32)))

    attn_out = pl.pallas_call(
        kernel,
        out_shape=jax.ShapeDtypeStruct((B, S_pad, D), out_dtype),
        # q-tile axis innermost: the (g,S,hd) k/v blocks (index depends only on
        # (b, hg)) stay resident in VMEM across all q tiles.
        grid=(B, n_hg, n_q),
        in_specs=[
            pl.BlockSpec((None, g, Tq, hd), lambda b, hg, qi: (b, hg, qi, 0)),
            pl.BlockSpec((None, g, S, hd),  lambda b, hg, qi: (b, hg, 0, 0)),
            pl.BlockSpec((None, g, S, hd),  lambda b, hg, qi: (b, hg, 0, 0)),
        ],
        out_specs=pl.BlockSpec((None, Tq, g * hd),
                               lambda b, hg, qi: (b, qi, hg)),
        compiler_params=pltpu.CompilerParams(
            dimension_semantics=("parallel", "parallel", "parallel"),
            vmem_limit_bytes=vmem_limit),
    )(q, k, v)

    # Output projection on the (already concat-head) kernel output.
    return attn_out[:, :S, :] @ wo


def _reference(x, wq, wk, wv, wo, n_heads, topk):
    """Pure-JAX reference mirroring the PyTorch forward (eval mode, f32)."""
    B, S, D = x.shape
    hd = D // n_heads
    q = (x @ wq).reshape(B, S, n_heads, hd).transpose(0, 2, 1, 3)
    k = (x @ wk).reshape(B, S, n_heads, hd).transpose(0, 2, 1, 3)
    v = (x @ wv).reshape(B, S, n_heads, hd).transpose(0, 2, 1, 3)
    scores = q @ jnp.swapaxes(k, -1, -2) / math.sqrt(hd)
    bias = jnp.where(jnp.triu(jnp.ones((S, S), dtype=bool), k=1), -jnp.inf, 0.0)
    scores = scores + bias
    kk = min(topk, S)
    _, idx = jax.lax.top_k(scores, kk)
    sel = jnp.any(jax.nn.one_hot(idx, S, dtype=jnp.bool_), axis=-2)
    sparse = jnp.where(sel, scores, 0.0)
    attn = jax.nn.softmax(sparse, axis=-1)
    out = (attn @ v).transpose(0, 2, 1, 3).reshape(B, S, D)
    return out @ wo


if __name__ == "__main__":
    B, S, D, H = 2, 8, 32, 4      # batch, seq, dim, n_heads  (head_dim = 8)
    TOPK = 3

    key = jax.random.PRNGKey(0)
    kx, kq, kk_, kv, ko, kx2 = jax.random.split(key, 6)
    x = jax.random.normal(kx, (B, S, D), dtype=jnp.float32)
    lim = 1.0 / math.sqrt(D)
    wq = jax.random.uniform(kq, (D, D), jnp.float32, -lim, lim)
    wk = jax.random.uniform(kk_, (D, D), jnp.float32, -lim, lim)
    wv = jax.random.uniform(kv, (D, D), jnp.float32, -lim, lim)
    wo = jax.random.uniform(ko, (D, D), jnp.float32, -lim, lim)

    # Exact-path validation (f32 compute) against the pure-JAX reference.
    out = jax.block_until_ready(
        sparse_attention(x, wq, wk, wv, wo, n_heads=H, topk=TOPK,
                         compute_dtype=jnp.float32))
    ref = jax.block_until_ready(_reference(x, wq, wk, wv, wo, H, TOPK))
    assert np.allclose(np.asarray(out), np.asarray(ref), atol=1e-4, rtol=1e-4), \
        "kernel output mismatch vs reference (f32 path)"

    # Multi-tile + padded-q-axis path (S=20, q_tile=8 -> 3 tiles, 4 pad rows).
    S2 = 20
    x2 = jax.random.normal(kx2, (1, S2, D), dtype=jnp.float32)
    out2 = jax.block_until_ready(
        sparse_attention(x2, wq, wk, wv, wo, n_heads=H, topk=TOPK,
                         compute_dtype=jnp.float32, q_tile=8))
    ref2 = jax.block_until_ready(_reference(x2, wq, wk, wv, wo, H, TOPK))
    assert np.allclose(np.asarray(out2), np.asarray(ref2), atol=1e-4, rtol=1e-4), \
        "kernel output mismatch vs reference (tiled/padded f32 path)"

    # bf16 fast path: smoke-run (bf16 rounding can flip top-k picks slightly).
    out_bf16 = jax.block_until_ready(
        sparse_attention(x, wq, wk, wv, wo, n_heads=H, topk=TOPK,
                         compute_dtype=jnp.bfloat16))
    assert out_bf16.shape == (B, S, D) and bool(jnp.all(jnp.isfinite(out_bf16)))

    print("KERNEL_OK")
</pallas_src>

<mosaic_0001>
module attributes {stable_mosaic.version = 11 : i64} {
  func.func @_sparse_attention_kernel(%arg0: i32, %arg1: i32, %arg2: i32, %arg3: memref<1x4x8x8xf32, #tpu.memory_space<vmem>>, %arg4: memref<1x4x8x8xf32, #tpu.memory_space<vmem>>, %arg5: memref<1x4x8x8xf32, #tpu.memory_space<vmem>>, %arg6: memref<1x8x32xf32, #tpu.memory_space<vmem>>) attributes {dimension_semantics = [#tpu.dimension_semantics<parallel>, #tpu.dimension_semantics<parallel>, #tpu.dimension_semantics<parallel>], iteration_bounds = array<i64: 2, 1, 1>, scalar_prefetch = 0 : i64, scratch_operands = 0 : i64, tpu.core_type = #tpu.core_type<tc>, window_params = [{transform_indices = @transform_0, window_bounds = array<i64: 1, 4, 8, 8>}, {transform_indices = @transform_1, window_bounds = array<i64: 1, 4, 8, 8>}, {transform_indices = @transform_2, window_bounds = array<i64: 1, 4, 8, 8>}, {transform_indices = @transform_3, window_bounds = array<i64: 1, 8, 32>}]} {
    %c8_i32 = arith.constant 8 : i32
    %0 = arith.muli %arg2, %c8_i32 : i32
    %1 = tpu.iota {dimensions = array<i32: 0>} : vector<8x8xi32>
    %2 = vector.broadcast %0 : i32 to vector<8x8xi32>
    %3 = arith.addi %2, %1 : vector<8x8xi32>
    %4 = tpu.iota {dimensions = array<i32: 1>} : vector<8x8xi32>
    %5 = arith.cmpi sle, %4, %3 : vector<8x8xi32>
    %c3_i32 = arith.constant 3 : i32
    %6 = vector.broadcast %c3_i32 : i32 to vector<8x8xi32>
    %7 = arith.cmpi slt, %3, %6 : vector<8x8xi32>
    %c3_i32_0 = arith.constant 3 : i32
    %8 = vector.broadcast %c3_i32_0 : i32 to vector<8x8xi32>
    %9 = arith.cmpi slt, %4, %8 : vector<8x8xi32>
    %10 = arith.andi %7, %9 : vector<8x8xi1>
    %c0 = arith.constant 0 : index
    %c0_1 = arith.constant 0 : index
    %c0_2 = arith.constant 0 : index
    %c0_3 = arith.constant 0 : index
    %11 = vector.load %arg3[%c0, %c0_1, %c0_2, %c0_3] : memref<1x4x8x8xf32, #tpu.memory_space<vmem>>, vector<1x1x8x8xf32>
    %12 = vector.shape_cast %11 : vector<1x1x8x8xf32> to vector<8x8xf32>
    %c0_4 = arith.constant 0 : index
    %c0_5 = arith.constant 0 : index
    %c0_6 = arith.constant 0 : index
    %c0_7 = arith.constant 0 : index
    %13 = vector.load %arg4[%c0_4, %c0_5, %c0_6, %c0_7] : memref<1x4x8x8xf32, #tpu.memory_space<vmem>>, vector<1x1x8x8xf32>
    %14 = vector.shape_cast %13 : vector<1x1x8x8xf32> to vector<8x8xf32>
    %c0_8 = arith.constant 0 : index
    %c0_9 = arith.constant 0 : index
    %c0_10 = arith.constant 0 : index
    %c0_11 = arith.constant 0 : index
    %15 = vector.load %arg5[%c0_8, %c0_9, %c0_10, %c0_11] : memref<1x4x8x8xf32, #tpu.memory_space<vmem>>, vector<1x1x8x8xf32>
    %16 = vector.shape_cast %15 : vector<1x1x8x8xf32> to vector<8x8xf32>
    %cst = arith.constant dense<0.000000e+00> : vector<8x8xf32>
    %17 = tpu.matmul %12, %14, %cst {dimension_numbers = #tpu.dot_dimension_numbers<[1], [1], [0], [0], [0, 0, 1, 0], [], []>} : vector<8x8xf32>, vector<8x8xf32>, vector<8x8xf32> -> vector<8x8xf32>
    %cst_12 = arith.constant 0.353553385 : f32
    %18 = vector.broadcast %cst_12 : f32 to vector<8x8xf32>
    %19 = arith.mulf %17, %18 : vector<8x8xf32>
    %cst_13 = arith.constant 0xFF800000 : f32
    %20 = vector.broadcast %cst_13 : f32 to vector<8x8xf32>
    %21 = arith.select %5, %19, %20 : vector<8x8xi1>, vector<8x8xf32>
    %cst_14 = arith.constant dense<0xFF800000> : vector<8xf32>
    %22 = vector.multi_reduction <maximumf>, %21, %cst_14 [1] : vector<8x8xf32> to vector<8xf32>
    %23 = vector.shape_cast %22 : vector<8xf32> to vector<8x1xf32>
    %24 = vector.broadcast %23 : vector<8x1xf32> to vector<8x8xf32>
    %25 = arith.cmpf oeq, %21, %24 : vector<8x8xf32>
    %cst_15 = arith.constant 0xFF800000 : f32
    %26 = vector.broadcast %cst_15 : f32 to vector<8x8xf32>
    %27 = arith.select %25, %26, %21 : vector<8x8xi1>, vector<8x8xf32>
    %cst_16 = arith.constant dense<0xFF800000> : vector<8xf32>
    %28 = vector.multi_reduction <maximumf>, %27, %cst_16 [1] : vector<8x8xf32> to vector<8xf32>
    %29 = vector.shape_cast %28 : vector<8xf32> to vector<8x1xf32>
    %30 = vector.broadcast %29 : vector<8x1xf32> to vector<8x8xf32>
    %31 = arith.cmpf oeq, %27, %30 : vector<8x8xf32>
    %cst_17 = arith.constant 0xFF800000 : f32
    %32 = vector.broadcast %cst_17 : f32 to vector<8x8xf32>
    %33 = arith.select %31, %32, %27 : vector<8x8xi1>, vector<8x8xf32>
    %cst_18 = arith.constant dense<0xFF800000> : vector<8xf32>
    %34 = vector.multi_reduction <maximumf>, %33, %cst_18 [1] : vector<8x8xf32> to vector<8xf32>
    %35 = vector.shape_cast %34 : vector<8xf32> to vector<8x1xf32>
    %36 = vector.broadcast %35 : vector<8x1xf32> to vector<8x8xf32>
    %37 = arith.cmpf oeq, %33, %36 : vector<8x8xf32>
    %cst_19 = arith.constant 0xFF800000 : f32
    %38 = vector.broadcast %cst_19 : f32 to vector<8x8xf32>
    %39 = arith.select %37, %38, %33 : vector<8x8xi1>, vector<8x8xf32>
    %cst_20 = arith.constant 0xFF800000 : f32
    %40 = vector.broadcast %cst_20 : f32 to vector<8x8xf32>
    %41 = arith.cmpf oeq, %39, %40 : vector<8x8xf32>
    %42 = arith.andi %41, %5 : vector<8x8xi1>
    %43 = arith.ori %42, %10 : vector<8x8xi1>
    %cst_21 = arith.constant 0.000000e+00 : f32
    %44 = vector.broadcast %cst_21 : f32 to vector<8x8xf32>
    %45 = arith.select %43, %21, %44 : vector<8x8xi1>, vector<8x8xf32>
    %cst_22 = arith.constant dense<0xFF800000> : vector<8xf32>
    %46 = vector.multi_reduction <maximumf>, %45, %cst_22 [1] : vector<8x8xf32> to vector<8xf32>
    %47 = vector.shape_cast %46 : vector<8xf32> to vector<8x1xf32>
    %48 = vector.broadcast %47 : vector<8x1xf32> to vector<8x8xf32>
    %49 = arith.subf %45, %48 : vector<8x8xf32>
    %50 = math.exp %49 : vector<8x8xf32>
    %cst_23 = arith.constant dense<0.000000e+00> : vector<8xf32>
    %51 = vector.multi_reduction <add>, %50, %cst_23 [1] : vector<8x8xf32> to vector<8xf32>
    %52 = vector.shape_cast %51 : vector<8xf32> to vector<8x1xf32>
    %53 = tpu.reciprocal %52 : vector<8x1xf32> -> vector<8x1xf32>
    %54 = vector.broadcast %53 : vector<8x1xf32> to vector<8x8xf32>
    %55 = arith.mulf %50, %54 : vector<8x8xf32>
    %cst_24 = arith.constant dense<0.000000e+00> : vector<8x8xf32>
    %56 = tpu.matmul %55, %16, %cst_24 {dimension_numbers = #tpu.dot_dimension_numbers<[1], [0], [0], [1], [0, 0, 1, 1], [], []>} : vector<8x8xf32>, vector<8x8xf32>, vector<8x8xf32> -> vector<8x8xf32>
    %c0_25 = arith.constant 0 : index
    %c1 = arith.constant 1 : index
    %c0_26 = arith.constant 0 : index
    %c0_27 = arith.constant 0 : index
    %57 = vector.load %arg3[%c0_25, %c1, %c0_26, %c0_27] : memref<1x4x8x8xf32, #tpu.memory_space<vmem>>, vector<1x1x8x8xf32>
    %58 = vector.shape_cast %57 : vector<1x1x8x8xf32> to vector<8x8xf32>
    %c0_28 = arith.constant 0 : index
    %c1_29 = arith.constant 1 : index
    %c0_30 = arith.constant 0 : index
    %c0_31 = arith.constant 0 : index
    %59 = vector.load %arg4[%c0_28, %c1_29, %c0_30, %c0_31] : memref<1x4x8x8xf32, #tpu.memory_space<vmem>>, vector<1x1x8x8xf32>
    %60 = vector.shape_cast %59 : vector<1x1x8x8xf32> to vector<8x8xf32>
    %c0_32 = arith.constant 0 : index
    %c1_33 = arith.constant 1 : index
    %c0_34 = arith.constant 0 : index
    %c0_35 = arith.constant 0 : index
    %61 = vector.load %arg5[%c0_32, %c1_33, %c0_34, %c0_35] : memref<1x4x8x8xf32, #tpu.memory_space<vmem>>, vector<1x1x8x8xf32>
    %62 = vector.shape_cast %61 : vector<1x1x8x8xf32> to vector<8x8xf32>
    %cst_36 = arith.constant dense<0.000000e+00> : vector<8x8xf32>
    %63 = tpu.matmul %58, %60, %cst_36 {dimension_numbers = #tpu.dot_dimension_numbers<[1], [1], [0], [0], [0, 0, 1, 0], [], []>} : vector<8x8xf32>, vector<8x8xf32>, vector<8x8xf32> -> vector<8x8xf32>
    %cst_37 = arith.constant 0.353553385 : f32
    %64 = vector.broadcast %cst_37 : f32 to vector<8x8xf32>
    %65 = arith.mulf %63, %64 : vector<8x8xf32>
    %cst_38 = arith.constant 0xFF800000 : f32
    %66 = vector.broadcast %cst_38 : f32 to vector<8x8xf32>
    %67 = arith.select %5, %65, %66 : vector<8x8xi1>, vector<8x8xf32>
    %cst_39 = arith.constant dense<0xFF800000> : vector<8xf32>
    %68 = vector.multi_reduction <maximumf>, %67, %cst_39 [1] : vector<8x8xf32> to vector<8xf32>
    %69 = vector.shape_cast %68 : vector<8xf32> to vector<8x1xf32>
    %70 = vector.broadcast %69 : vector<8x1xf32> to vector<8x8xf32>
    %71 = arith.cmpf oeq, %67, %70 : vector<8x8xf32>
    %cst_40 = arith.constant 0xFF800000 : f32
    %72 = vector.broadcast %cst_40 : f32 to vector<8x8xf32>
    %73 = arith.select %71, %72, %67 : vector<8x8xi1>, vector<8x8xf32>
    %cst_41 = arith.constant dense<0xFF800000> : vector<8xf32>
    %74 = vector.multi_reduction <maximumf>, %73, %cst_41 [1] : vector<8x8xf32> to vector<8xf32>
    %75 = vector.shape_cast %74 : vector<8xf32> to vector<8x1xf32>
    %76 = vector.broadcast %75 : vector<8x1xf32> to vector<8x8xf32>
    %77 = arith.cmpf oeq, %73, %76 : vector<8x8xf32>
    %cst_42 = arith.constant 0xFF800000 : f32
    %78 = vector.broadcast %cst_42 : f32 to vector<8x8xf32>
    %79 = arith.select %77, %78, %73 : vector<8x8xi1>, vector<8x8xf32>
    %cst_43 = arith.constant dense<0xFF800000> : vector<8xf32>
    %80 = vector.multi_reduction <maximumf>, %79, %cst_43 [1] : vector<8x8xf32> to vector<8xf32>
    %81 = vector.shape_cast %80 : vector<8xf32> to vector<8x1xf32>
    %82 = vector.broadcast %81 : vector<8x1xf32> to vector<8x8xf32>
    %83 = arith.cmpf oeq, %79, %82 : vector<8x8xf32>
    %cst_44 = arith.constant 0xFF800000 : f32
    %84 = vector.broadcast %cst_44 : f32 to vector<8x8xf32>
    %85 = arith.select %83, %84, %79 : vector<8x8xi1>, vector<8x8xf32>
    %cst_45 = arith.constant 0xFF800000 : f32
    %86 = vector.broadcast %cst_45 : f32 to vector<8x8xf32>
    %87 = arith.cmpf oeq, %85, %86 : vector<8x8xf32>
    %88 = arith.andi %87, %5 : vector<8x8xi1>
    %89 = arith.ori %88, %10 : vector<8x8xi1>
    %cst_46 = arith.constant 0.000000e+00 : f32
    %90 = vector.broadcast %cst_46 : f32 to vector<8x8xf32>
    %91 = arith.select %89, %67, %90 : vector<8x8xi1>, vector<8x8xf32>
    %cst_47 = arith.constant dense<0xFF800000> : vector<8xf32>
    %92 = vector.multi_reduction <maximumf>, %91, %cst_47 [1] : vector<8x8xf32> to vector<8xf32>
    %93 = vector.shape_cast %92 : vector<8xf32> to vector<8x1xf32>
    %94 = vector.broadcast %93 : vector<8x1xf32> to vector<8x8xf32>
    %95 = arith.subf %91, %94 : vector<8x8xf32>
    %96 = math.exp %95 : vector<8x8xf32>
    %cst_48 = arith.constant dense<0.000000e+00> : vector<8xf32>
    %97 = vector.multi_reduction <add>, %96, %cst_48 [1] : vector<8x8xf32> to vector<8xf32>
    %98 = vector.shape_cast %97 : vector<8xf32> to vector<8x1xf32>
    %99 = tpu.reciprocal %98 : vector<8x1xf32> -> vector<8x1xf32>
    %100 = vector.broadcast %99 : vector<8x1xf32> to vector<8x8xf32>
    %101 = arith.mulf %96, %100 : vector<8x8xf32>
    %cst_49 = arith.constant dense<0.000000e+00> : vector<8x8xf32>
    %102 = tpu.matmul %101, %62, %cst_49 {dimension_numbers = #tpu.dot_dimension_numbers<[1], [0], [0], [1], [0, 0, 1, 1], [], []>} : vector<8x8xf32>, vector<8x8xf32>, vector<8x8xf32> -> vector<8x8xf32>
    %c0_50 = arith.constant 0 : index
    %c2 = arith.constant 2 : index
    %c0_51 = arith.constant 0 : index
    %c0_52 = arith.constant 0 : index
    %103 = vector.load %arg3[%c0_50, %c2, %c0_51, %c0_52] : memref<1x4x8x8xf32, #tpu.memory_space<vmem>>, vector<1x1x8x8xf32>
    %104 = vector.shape_cast %103 : vector<1x1x8x8xf32> to vector<8x8xf32>
    %c0_53 = arith.constant 0 : index
    %c2_54 = arith.constant 2 : index
    %c0_55 = arith.constant 0 : index
    %c0_56 = arith.constant 0 : index
    %105 = vector.load %arg4[%c0_53, %c2_54, %c0_55, %c0_56] : memref<1x4x8x8xf32, #tpu.memory_space<vmem>>, vector<1x1x8x8xf32>
    %106 = vector.shape_cast %105 : vector<1x1x8x8xf32> to vector<8x8xf32>
    %c0_57 = arith.constant 0 : index
    %c2_58 = arith.constant 2 : index
    %c0_59 = arith.constant 0 : index
    %c0_60 = arith.constant 0 : index
    %107 = vector.load %arg5[%c0_57, %c2_58, %c0_59, %c0_60] : memref<1x4x8x8xf32, #tpu.memory_space<vmem>>, vector<1x1x8x8xf32>
    %108 = vector.shape_cast %107 : vector<1x1x8x8xf32> to vector<8x8xf32>
    %cst_61 = arith.constant dense<0.000000e+00> : vector<8x8xf32>
    %109 = tpu.matmul %104, %106, %cst_61 {dimension_numbers = #tpu.dot_dimension_numbers<[1], [1], [0], [0], [0, 0, 1, 0], [], []>} : vector<8x8xf32>, vector<8x8xf32>, vector<8x8xf32> -> vector<8x8xf32>
    %cst_62 = arith.constant 0.353553385 : f32
    %110 = vector.broadcast %cst_62 : f32 to vector<8x8xf32>
    %111 = arith.mulf %109, %110 : vector<8x8xf32>
    %cst_63 = arith.constant 0xFF800000 : f32
    %112 = vector.broadcast %cst_63 : f32 to vector<8x8xf32>
    %113 = arith.select %5, %111, %112 : vector<8x8xi1>, vector<8x8xf32>
    %cst_64 = arith.constant dense<0xFF800000> : vector<8xf32>
    %114 = vector.multi_reduction <maximumf>, %113, %cst_64 [1] : vector<8x8xf32> to vector<8xf32>
    %115 = vector.shape_cast %114 : vector<8xf32> to vector<8x1xf32>
    %116 = vector.broadcast %115 : vector<8x1xf32> to vector<8x8xf32>
    %117 = arith.cmpf oeq, %113, %116 : vector<8x8xf32>
    %cst_65 = arith.constant 0xFF800000 : f32
    %118 = vector.broadcast %cst_65 : f32 to vector<8x8xf32>
    %119 = arith.select %117, %118, %113 : vector<8x8xi1>, vector<8x8xf32>
    %cst_66 = arith.constant dense<0xFF800000> : vector<8xf32>
    %120 = vector.multi_reduction <maximumf>, %119, %cst_66 [1] : vector<8x8xf32> to vector<8xf32>
    %121 = vector.shape_cast %120 : vector<8xf32> to vector<8x1xf32>
    %122 = vector.broadcast %121 : vector<8x1xf32> to vector<8x8xf32>
    %123 = arith.cmpf oeq, %119, %122 : vector<8x8xf32>
    %cst_67 = arith.constant 0xFF800000 : f32
    %124 = vector.broadcast %cst_67 : f32 to vector<8x8xf32>
    %125 = arith.select %123, %124, %119 : vector<8x8xi1>, vector<8x8xf32>
    %cst_68 = arith.constant dense<0xFF800000> : vector<8xf32>
    %126 = vector.multi_reduction <maximumf>, %125, %cst_68 [1] : vector<8x8xf32> to vector<8xf32>
    %127 = vector.shape_cast %126 : vector<8xf32> to vector<8x1xf32>
    %128 = vector.broadcast %127 : vector<8x1xf32> to vector<8x8xf32>
    %129 = arith.cmpf oeq, %125, %128 : vector<8x8xf32>
    %cst_69 = arith.constant 0xFF800000 : f32
    %130 = vector.broadcast %cst_69 : f32 to vector<8x8xf32>
    %131 = arith.select %129, %130, %125 : vector<8x8xi1>, vector<8x8xf32>
    %cst_70 = arith.constant 0xFF800000 : f32
    %132 = vector.broadcast %cst_70 : f32 to vector<8x8xf32>
    %133 = arith.cmpf oeq, %131, %132 : vector<8x8xf32>
    %134 = arith.andi %133, %5 : vector<8x8xi1>
    %135 = arith.ori %134, %10 : vector<8x8xi1>
    %cst_71 = arith.constant 0.000000e+00 : f32
    %136 = vector.broadcast %cst_71 : f32 to vector<8x8xf32>
    %137 = arith.select %135, %113, %136 : vector<8x8xi1>, vector<8x8xf32>
    %cst_72 = arith.constant dense<0xFF800000> : vector<8xf32>
    %138 = vector.multi_reduction <maximumf>, %137, %cst_72 [1] : vector<8x8xf32> to vector<8xf32>
    %139 = vector.shape_cast %138 : vector<8xf32> to vector<8x1xf32>
    %140 = vector.broadcast %139 : vector<8x1xf32> to vector<8x8xf32>
    %141 = arith.subf %137, %140 : vector<8x8xf32>
    %142 = math.exp %141 : vector<8x8xf32>
    %cst_73 = arith.constant dense<0.000000e+00> : vector<8xf32>
    %143 = vector.multi_reduction <add>, %142, %cst_73 [1] : vector<8x8xf32> to vector<8xf32>
    %144 = vector.shape_cast %143 : vector<8xf32> to vector<8x1xf32>
    %145 = tpu.reciprocal %144 : vector<8x1xf32> -> vector<8x1xf32>
    %146 = vector.broadcast %145 : vector<8x1xf32> to vector<8x8xf32>
    %147 = arith.mulf %142, %146 : vector<8x8xf32>
    %cst_74 = arith.constant dense<0.000000e+00> : vector<8x8xf32>
    %148 = tpu.matmul %147, %108, %cst_74 {dimension_numbers = #tpu.dot_dimension_numbers<[1], [0], [0], [1], [0, 0, 1, 1], [], []>} : vector<8x8xf32>, vector<8x8xf32>, vector<8x8xf32> -> vector<8x8xf32>
    %c0_75 = arith.constant 0 : index
    %c3 = arith.constant 3 : index
    %c0_76 = arith.constant 0 : index
    %c0_77 = arith.constant 0 : index
    %149 = vector.load %arg3[%c0_75, %c3, %c0_76, %c0_77] : memref<1x4x8x8xf32, #tpu.memory_space<vmem>>, vector<1x1x8x8xf32>
    %150 = vector.shape_cast %149 : vector<1x1x8x8xf32> to vector<8x8xf32>
    %c0_78 = arith.constant 0 : index
    %c3_79 = arith.constant 3 : index
    %c0_80 = arith.constant 0 : index
    %c0_81 = arith.constant 0 : index
    %151 = vector.load %arg4[%c0_78, %c3_79, %c0_80, %c0_81] : memref<1x4x8x8xf32, #tpu.memory_space<vmem>>, vector<1x1x8x8xf32>
    %152 = vector.shape_cast %151 : vector<1x1x8x8xf32> to vector<8x8xf32>
    %c0_82 = arith.constant 0 : index
    %c3_83 = arith.constant 3 : index
    %c0_84 = arith.constant 0 : index
    %c0_85 = arith.constant 0 : index
    %153 = vector.load %arg5[%c0_82, %c3_83, %c0_84, %c0_85] : memref<1x4x8x8xf32, #tpu.memory_space<vmem>>, vector<1x1x8x8xf32>
    %154 = vector.shape_cast %153 : vector<1x1x8x8xf32> to vector<8x8xf32>
    %cst_86 = arith.constant dense<0.000000e+00> : vector<8x8xf32>
    %155 = tpu.matmul %150, %152, %cst_86 {dimension_numbers = #tpu.dot_dimension_numbers<[1], [1], [0], [0], [0, 0, 1, 0], [], []>} : vector<8x8xf32>, vector<8x8xf32>, vector<8x8xf32> -> vector<8x8xf32>
    %cst_87 = arith.constant 0.353553385 : f32
    %156 = vector.broadcast %cst_87 : f32 to vector<8x8xf32>
    %157 = arith.mulf %155, %156 : vector<8x8xf32>
    %cst_88 = arith.constant 0xFF800000 : f32
    %158 = vector.broadcast %cst_88 : f32 to vector<8x8xf32>
    %159 = arith.select %5, %157, %158 : vector<8x8xi1>, vector<8x8xf32>
    %cst_89 = arith.constant dense<0xFF800000> : vector<8xf32>
    %160 = vector.multi_reduction <maximumf>, %159, %cst_89 [1] : vector<8x8xf32> to vector<8xf32>
    %161 = vector.shape_cast %160 : vector<8xf32> to vector<8x1xf32>
    %162 = vector.broadcast %161 : vector<8x1xf32> to vector<8x8xf32>
    %163 = arith.cmpf oeq, %159, %162 : vector<8x8xf32>
    %cst_90 = arith.constant 0xFF800000 : f32
    %164 = vector.broadcast %cst_90 : f32 to vector<8x8xf32>
    %165 = arith.select %163, %164, %159 : vector<8x8xi1>, vector<8x8xf32>
    %cst_91 = arith.constant dense<0xFF800000> : vector<8xf32>
    %166 = vector.multi_reduction <maximumf>, %165, %cst_91 [1] : vector<8x8xf32> to vector<8xf32>
    %167 = vector.shape_cast %166 : vector<8xf32> to vector<8x1xf32>
    %168 = vector.broadcast %167 : vector<8x1xf32> to vector<8x8xf32>
    %169 = arith.cmpf oeq, %165, %168 : vector<8x8xf32>
    %cst_92 = arith.constant 0xFF800000 : f32
    %170 = vector.broadcast %cst_92 : f32 to vector<8x8xf32>
    %171 = arith.select %169, %170, %165 : vector<8x8xi1>, vector<8x8xf32>
    %cst_93 = arith.constant dense<0xFF800000> : vector<8xf32>
    %172 = vector.multi_reduction <maximumf>, %171, %cst_93 [1] : vector<8x8xf32> to vector<8xf32>
    %173 = vector.shape_cast %172 : vector<8xf32> to vector<8x1xf32>
    %174 = vector.broadcast %173 : vector<8x1xf32> to vector<8x8xf32>
    %175 = arith.cmpf oeq, %171, %174 : vector<8x8xf32>
    %cst_94 = arith.constant 0xFF800000 : f32
    %176 = vector.broadcast %cst_94 : f32 to vector<8x8xf32>
    %177 = arith.select %175, %176, %171 : vector<8x8xi1>, vector<8x8xf32>
    %cst_95 = arith.constant 0xFF800000 : f32
    %178 = vector.broadcast %cst_95 : f32 to vector<8x8xf32>
    %179 = arith.cmpf oeq, %177, %178 : vector<8x8xf32>
    %180 = arith.andi %179, %5 : vector<8x8xi1>
    %181 = arith.ori %180, %10 : vector<8x8xi1>
    %cst_96 = arith.constant 0.000000e+00 : f32
    %182 = vector.broadcast %cst_96 : f32 to vector<8x8xf32>
    %183 = arith.select %181, %159, %182 : vector<8x8xi1>, vector<8x8xf32>
    %cst_97 = arith.constant dense<0xFF800000> : vector<8xf32>
    %184 = vector.multi_reduction <maximumf>, %183, %cst_97 [1] : vector<8x8xf32> to vector<8xf32>
    %185 = vector.shape_cast %184 : vector<8xf32> to vector<8x1xf32>
    %186 = vector.broadcast %185 : vector<8x1xf32> to vector<8x8xf32>
    %187 = arith.subf %183, %186 : vector<8x8xf32>
    %188 = math.exp %187 : vector<8x8xf32>
    %cst_98 = arith.constant dense<0.000000e+00> : vector<8xf32>
    %189 = vector.multi_reduction <add>, %188, %cst_98 [1] : vector<8x8xf32> to vector<8xf32>
    %190 = vector.shape_cast %189 : vector<8xf32> to vector<8x1xf32>
    %191 = tpu.reciprocal %190 : vector<8x1xf32> -> vector<8x1xf32>
    %192 = vector.broadcast %191 : vector<8x1xf32> to vector<8x8xf32>
    %193 = arith.mulf %188, %192 : vector<8x8xf32>
    %cst_99 = arith.constant dense<0.000000e+00> : vector<8x8xf32>
    %194 = tpu.matmul %193, %154, %cst_99 {dimension_numbers = #tpu.dot_dimension_numbers<[1], [0], [0], [1], [0, 0, 1, 1], [], []>} : vector<8x8xf32>, vector<8x8xf32>, vector<8x8xf32> -> vector<8x8xf32>
    %195 = tpu.concatenate %56, %102, %148, %194 in 1 : vector<8x8xf32>, vector<8x8xf32>, vector<8x8xf32>, vector<8x8xf32> -> vector<8x32xf32>
    %c0_100 = arith.constant 0 : index
    %c0_101 = arith.constant 0 : index
    %c0_102 = arith.constant 0 : index
    %196 = vector.load %arg6[%c0_100, %c0_101, %c0_102] : memref<1x8x32xf32, #tpu.memory_space<vmem>>, vector<1x8x32xf32>
    %197 = vector.shape_cast %196 : vector<1x8x32xf32> to vector<8x32xf32>
    %198 = vector.shape_cast %195 : vector<8x32xf32> to vector<1x8x32xf32>
    tpu.vector_store %arg6[%c0_100, %c0_101, %c0_102], %198 {strides = array<i32>} : memref<1x8x32xf32, #tpu.memory_space<vmem>>, vector<1x8x32xf32>,
    return
  }
  func.func @transform_0(%arg0: i32, %arg1: i32, %arg2: i32) -> (i32, i32, i32, i32) {
    %c0_i32 = arith.constant 0 : i32
    %c0_i32_0 = arith.constant 0 : i32
    return %arg0, %arg1, %arg2, %c0_i32 : i32, i32, i32, i32
  }
  func.func @transform_1(%arg0: i32, %arg1: i32, %arg2: i32) -> (i32, i32, i32, i32) {
    %c0_i32 = arith.constant 0 : i32
    %c0_i32_0 = arith.constant 0 : i32
    %c0_i32_1 = arith.constant 0 : i32
    return %arg0, %arg1, %c0_i32, %c0_i32_0 : i32, i32, i32, i32
  }
  func.func @transform_2(%arg0: i32, %arg1: i32, %arg2: i32) -> (i32, i32, i32, i32) {
    %c0_i32 = arith.constant 0 : i32
    %c0_i32_0 = arith.constant 0 : i32
    %c0_i32_1 = arith.constant 0 : i32
    return %arg0, %arg1, %c0_i32, %c0_i32_0 : i32, i32, i32, i32
  }
  func.func @transform_3(%arg0: i32, %arg1: i32, %arg2: i32) -> (i32, i32, i32) {
    %c0_i32 = arith.constant 0 : i32
    return %arg0, %arg2, %arg1 : i32, i32, i32
  }
}

</mosaic_0001>

<bundles_post_ra>
// kernel: tpu_custom_call.1
= control target key start
LH: loop header
LB: loop body
LE: loop exit
PB: predicated region body
PF: predicated region fallthrough
CT: control target
= control target key end

     0   :  { %s2033_s0 = inlined_call_operand.hbm [shape: f32[2,4,8,8], index: 0, kind: input, shape index: {}]   ;;  %s2034_s1 = inlined_call_operand.hbm [shape: f32[2,4,8,8], index: 1, kind: input, shape index: {}]   ;;  %s2035_s2 = inlined_call_operand.hbm [shape: f32[2,4,8,8], index: 2, kind: input, shape index: {}]   ;;  %s2036_s3 = inlined_call_operand.hbm [shape: f32[2,8,32], index: 3, kind: output, shape index: {}]  }
   0x1   :  { %2046 = sst [smem:[#allocation15_spill]] %s2034_s1 }
   0x2   :  { %8 = vsyncpa [#allocation3], 0 }
   0x3   :  { %10 = vsyncpa [#allocation3 + $0x1], 0 }
   0x4   :  { %11 = vsyncpa [#allocation6], 0 }
   0x5   :  { %13 = vsyncpa [#allocation6 + $0x1], 0 }
   0x6   :  { %14 = vsyncpa [#allocation4], 0 }
   0x7   :  { %16 = vsyncpa [#allocation4 + $0x1], 0  ;;  %s1641_s12 = smov 0   ;;  %s1643_s13 = smov 0  }
   0x8   :  { %s1645_s14 = smov 0   ;;  %s1647_s15 = smov 0  }
   0x9   :  { %s1649_s16 = smov 0   ;;  %s1651_s17 = smov 0  }
   0xa LB: > { %2047 = sst [smem:[#allocation12_spill]] %s1604_s16  ;;  %s1672_s18 = sadd.s32 4294967295, %s1608_s17   ;;  %s1608_s17 = sphi %s1651_s17, %s22_s17   ;;  %s1604_s16 = sphi %s1649_s16, %s2074_s16   ;;  %s1600_s15 = sphi %s1647_s15, %s2073_s15   ;;  %s1596_s14 = sphi %s1645_s14, %s2077_s14   ;;  %s1592_s13 = sphi %s1643_s13, %s2076_s13   ;;  %s1588_s12 = sphi %s1641_s12, %s2075_s12  }
   0xb   : > { %s1236_s19 = sadd.s32 4294967294, %s1608_s17   ;;  %s41_s20 = sadd.s32 1, %s1604_s16 }
   0xc   : > { %s52_s21 = sadd.s32 1, %s1596_s14  ;;  %p43_p0 = scmp.ge.s32.totalorder %s41_s20, 2 }
   0xd   : > { %p59_p1 = scmp.ne.s32.totalorder %s1596_s14, %s1592_s13  ;;  %p60_p2 = scmp.eq.s32.totalorder %s1608_s17, 0 }
   0xe   : > { %p65_p3 = scmp.ne.s32.totalorder %s1592_s13, %s1588_s12  ;;  %s2079_s20 = smov (%p43_p0, %s41_s20), 0 }
   0xf   : > { %2048 = sst [smem:[#allocation13_spill]] %s2079_s20  ;;  %p1684_p4 = por %p60_p2, %p59_p1 }
  0x10   : > { %p66_p5 = scmp.eq.s32.totalorder %s1672_s18, 0  ;;  %s45_s23 = ssub.s32 %s1604_s16, %s2079_s20 }
  0x11   : > { %p149_p6 = scmp.eq.s32.totalorder %s1672_s18, 1  ;;  %p50_p7 = scmp.eq.s32.totalorder %s45_s23, 0 }
  0x12   : > { %p1692_p8 = por %p66_p5, %p65_p3  ;;  %p155_p10 = scmp.eq.s32.totalorder %s1236_s19, 1 }
  0x13   : > { %p1696_p9 = por %p149_p6, %p59_p1  ;;  %p1359_p13 = scmp.lt.s32.totalorder %s1608_s17, 2 }
  0x14   : > { %s2050_s24 = scalar_select %p1692_p8, 1, 0 }
  0x15   : > { %s2051_s25 = scalar_select %p1696_p9, 1, 0 }
  0x16   : > { %s1701_s26 = scalar_select %p50_p7, %s1596_s14, %s52_s21  }
  0x17   : > { %p1703_p11 = por %p155_p10, %p65_p3  ;;  %s2039_s28 = sand.u32 1, %s1596_s14  }
  0x18   : > { %2052 = sst [smem:[#allocation14_spill]] %s1701_s26  ;;  %s1712_s29 = sshll.u32 %s2039_s28, 5 }
  0x19   : > { %s2053_s27 = scalar_select %p1703_p11, 1, 0 }
  0x1a   : > { %s1715_s30 = sshll.u32 %s1604_s16, 9  ;;  %p1719_p0 = pnand %p1359_p13, %p1684_p4 }
  0x1b   : > { %s199_s5 = sand.u32 1, %s1608_s17   ;;  %s2055_s1 = sld [smem:[#allocation15_spill]] }
  0x1c   : > { %s203_s9 = scalar_lea.vmem [#allocation5], %s1712_s29  ;;  %s1735_s11 = scalar_lea.sflag [#allocation6], %s199_s5 }
  0x1d   : > { %s212_s10 = sshll.u32 %s203_s9, 4  ;;  %p1741_p4 = pneg %p1719_p0  ;;  %s1732_s10 = int_to_ptr.vmem [resolvable:$true] %s212_s10 }
  0x21   : > { %s1728_s8 = scalar_lea.hbm %s2055_s1, %s1715_s30  ;;  %s1437_s6 = scalar_lea.hbm %s2055_s1, 1024 }
  0x22   : > { %s1432_s19 = scalar_lea.hbm %s1728_s8, 512  ;;  %p1438_p7 = scmp.lt.u32.totalorder %s1728_s8, %s2055_s1 }
  0x23   : > { %p1433_p3 = scmp.ne.s32.totalorder %s1728_s8, %s1432_s19  ;;  %p1439_p10 = scmp.lt.u32.totalorder %s1437_s6, %s1432_s19 }
  0x24   : > { %p1441_p12 = scmp.lt.u32.totalorder %s1432_s19, %s1728_s8 }
  0x25   : > { %p1435_p5 = pnand %p1741_p4, %p1433_p3  ;;  %p1440_p13 = por %p1439_p10, %p1438_p7 }
  0x27   : > { %p1436_p6 = pneg %p1435_p5  ;;  %p1442_p1 = por %p1441_p12, %p1440_p13 }
  0x29   : > { %p1443_p2 = pnand %p1442_p1, %p1436_p6 }
  0x2b   : > { %1446 = shalt.err (!%p1443_p2)
}
  0x2c   : > { %s1447_s5 = scalar_lea.vmem %s1732_s10, 512  ;;  %s1610_s22 = smov [#allocation5]  }
  0x2d   : > { %p1448_p3 = scmp.ne.s32.totalorder %s1732_s10, %s1447_s5  ;;  %s1452_s23 = sshll.u32 %s1610_s22, 4  ;;  %s1453_s23 = int_to_ptr.vmem [resolvable:$false] %s1452_s23 }
  0x2e   : > { %s1454_s7 = scalar_lea.vmem %s1453_s23, 1024  ;;  %p1455_p9 = scmp.lt.s32.totalorder %s1732_s10, %s1453_s23 }
  0x2f   : > { %p1450_p5 = pnand %p1448_p3, %p1741_p4  ;;  %p1456_p8 = scmp.lt.s32.totalorder %s1454_s7, %s1447_s5 }
  0x31   : > { %p1451_p11 = pneg %p1450_p5  ;;  %p1457_p7 = por %p1456_p8, %p1455_p9 }
  0x33   : > { %p1458_p10 = pnand %p1457_p7, %p1451_p11 }
  0x35   : > { %1461 = shalt.err (!%p1458_p10)
}
  0x36   : > { %s2040_s19 = smov 128   ;;  %s2042_s6 = smov 8  }
  0x37   : > { %1351 = dma.hbm_to_vmem [thread:$0]  (!%p1719_p0), %s1728_s8, 512, %s1732_s10, %s1735_s11, %s2040_s19, %s2040_s19, %s2042_s6  }
  0x38   : > { %p2057_p8 = scmp.lt.s32.totalorder %s1608_s17, 3  ;;  %p2058_p9 = scmp.ge.s32.totalorder %s1608_s17, 1 }
  0x39   : > { %s1780_s23 = scalar_lea.hbm %s2033_s0, %s1715_s30  ;;  %s179_s7 = scalar_lea.vmem [#allocation2], %s1712_s29 }
  0x3a   : > { %p1772_p11 = pnand %p2058_p9, %p2057_p8  ;;  %s189_s28 = sshll.u32 %s179_s7, 4  ;;  %s1783_s28 = int_to_ptr.vmem [resolvable:$true] %s189_s28 }
  0x3b   : > { %s1789_s19 = scalar_lea.hbm %s2035_s2, %s1715_s30  ;;  %s2060_s6 = sand.u32 1, %s1596_s14  }
  0x3c   : > { %s2059_s9 = scalar_select %p1772_p11, 1, 0 }
  0x3d   : > { %s1793_s1 = scalar_lea.sflag [#allocation3], %s2060_s6  ;;  %s1462_s20 = scalar_lea.hbm %s1780_s23, 512 }
  0x3e   : > { %p1463_p12 = scmp.ne.s32.totalorder %s1780_s23, %s1462_s20  ;;  %s1467_s16 = scalar_lea.hbm %s2033_s0, 1024 }
  0x3f   : > { %p1468_p6 = scmp.lt.u32.totalorder %s1780_s23, %s2033_s0  ;;  %p1469_p13 = scmp.lt.u32.totalorder %s1467_s16, %s1462_s20 }
  0x40   : > { %p1465_p1 = pnand %p1463_p12, %p1741_p4  ;;  %p1471_p5 = scmp.lt.u32.totalorder %s1462_s20, %s1780_s23 }
  0x41   : > { %p1470_p3 = por %p1469_p13, %p1468_p6 }
  0x42   : > { %p1466_p2 = pneg %p1465_p1 }
  0x43   : > { %p1472_p7 = por %p1471_p5, %p1470_p3 }
  0x45   : > { %p1473_p10 = pnand %p1472_p7, %p1466_p2 }
  0x47   : > { %1476 = shalt.err (!%p1473_p10)
}
  0x48   : > { %s1477_s30 = scalar_lea.vmem %s1783_s28, 512  ;;  %s1613_s6 = smov [#allocation2]  }
  0x49   : > { %p1478_p8 = scmp.ne.s32.totalorder %s1783_s28, %s1477_s30  ;;  %s1482_s8 = sshll.u32 %s1613_s6, 4  ;;  %s1483_s8 = int_to_ptr.vmem [resolvable:$false] %s1482_s8 }
  0x4a   : > { %s1484_s26 = scalar_lea.vmem %s1483_s8, 1024  ;;  %p1485_p1 = scmp.lt.s32.totalorder %s1783_s28, %s1483_s8 }
  0x4b   : > { %p1480_p9 = pnand %p1478_p8, %p1741_p4  ;;  %p1486_p11 = scmp.lt.s32.totalorder %s1484_s26, %s1477_s30 }
  0x4d   : > { %p1481_p12 = pneg %p1480_p9  ;;  %p1487_p6 = por %p1486_p11, %p1485_p1 }
  0x4f   : > { %p1488_p13 = pnand %p1487_p6, %p1481_p12 }
  0x51   : > { %1491 = shalt.err (!%p1488_p13)
}
  0x52   : > { %s2061_s16 = smov 8   ;;  %s2062_s20 = smov 128  }
  0x53   : > { %1348 = dma.hbm_to_vmem [thread:$0]  (!%p1719_p0), %s1780_s23, 512, %s1783_s28, %s1793_s1, %s2062_s20, %s2062_s20, %s2061_s16  }
  0x54   : > { %s226_s10 = scalar_lea.vmem [#allocation7], %s1712_s29  ;;  %s1492_s22 = scalar_lea.hbm %s1789_s19, 512 }
  0x55   : > { %s235_s5 = sshll.u32 %s226_s10, 4  ;;  %p1493_p11 = scmp.ne.s32.totalorder %s1789_s19, %s1492_s22  ;;  %s1821_s5 = int_to_ptr.vmem [resolvable:$true] %s235_s5 }
  0x56   : > { %s1497_s6 = scalar_lea.hbm %s2035_s2, 1024  ;;  %p1498_p5 = scmp.lt.u32.totalorder %s1789_s19, %s2035_s2 }
  0x57   : > { %p1495_p2 = pnand %p1493_p11, %p1741_p4  ;;  %p1499_p7 = scmp.lt.u32.totalorder %s1497_s6, %s1492_s22 }
  0x58   : > { %p1501_p8 = scmp.lt.u32.totalorder %s1492_s22, %s1789_s19 }
  0x59   : > { %p1496_p3 = pneg %p1495_p2  ;;  %p1500_p10 = por %p1499_p7, %p1498_p5 }
  0x5b   : > { %p1502_p9 = por %p1501_p8, %p1500_p10 }
  0x5d   : > { %p1503_p12 = pnand %p1502_p9, %p1496_p3 }
  0x5f   : > { %1506 = shalt.err (!%p1503_p12)
}
  0x60   : > { %s1507_s1 = scalar_lea.vmem %s1821_s5, 512  ;;  %s1614_s28 = smov [#allocation7]  }
  0x61   : > { %p1508_p1 = scmp.ne.s32.totalorder %s1821_s5, %s1507_s1  ;;  %s1512_s29 = sshll.u32 %s1614_s28, 4  ;;  %s1513_s29 = int_to_ptr.vmem [resolvable:$false] %s1512_s29 }
  0x62   : > { %s1514_s23 = scalar_lea.vmem %s1513_s29, 1024  ;;  %p1515_p11 = scmp.lt.s32.totalorder %s1821_s5, %s1513_s29 }
  0x63   : > { %p1510_p6 = pnand %p1508_p1, %p1741_p4  ;;  %p1516_p2 = scmp.lt.s32.totalorder %s1514_s23, %s1507_s1 }
  0x65   : > { %p1511_p13 = pneg %p1510_p6  ;;  %p1517_p5 = por %p1516_p2, %p1515_p11 }
  0x67   : > { %p1518_p7 = pnand %p1517_p5, %p1511_p13 }
  0x69   : > { %1521 = shalt.err (!%p1518_p7)
}
  0x6a   : > { %1354 = dma.hbm_to_vmem [thread:$0]  (!%p1719_p0), %s1789_s19, 512, %s1821_s5, %s1735_s11, %s2062_s20, %s2062_s20, %s2061_s16  }
  0x6b   : > { %p2063_p4 = scmp.ne.s32.totalorder %s2059_s9, 0 }
  0x6c   : > { %s1851_s21 = sand.u32 (!%p2063_p4), 1, %s1592_s13   ;;  %p2064_p3 = scmp.ne.s32.totalorder (!%p2063_p4), %s2050_s24, 0 }
  0x6d   : > { %247 = sbr.rel (%p2063_p4) target bundleno = 2416 (0x970), region = 32  ;;  %s1854_s10 = sshll.u32 (!%p2063_p4), %s1851_s21, 5 }
  0x6e   : > { %s250_s4 = scalar_lea.sflag (!%p2063_p4), [#allocation3], %s1851_s21  ;;  %s1858_s22 = scalar_lea.vmem (!%p2063_p4), [#allocation2], %s1854_s10 }
  0x74   : > { %1575 = dma.done.wait (%p2064_p3), %s250_s4, 512  }
  0x75   : > { %1577 = vsyncadd (%p2064_p3), %s250_s4, 4294966784  ;;  %s258_s11 = sand.u32 1, %s1672_s18   ;;  %s1866_s9 = scalar_lea.vmem [#allocation5], %s1854_s10 }
  0x76   : > { %s259_s19 = scalar_lea.sflag [#allocation6], %s258_s11 }
  0x77   : > { %1579 = dma.done.wait (%p2064_p3), %s259_s19, 1024  }
  0x78   : > { %1581 = vsyncadd (%p2064_p3), %s259_s19, 4294966272  ;;  %v1615_v0 = vmov 0.0   ;;  %vm1616_vm0 = vmmov 0   ;;  %vm321_vm1 = vcmask 64512   ;;  %v319_v1 = vld [vmem:[%s1866_s9] sm:$0xff]  ;;  %v308_v3 = vlaneseq  ;;  %s1905_s18 = scalar_lea.vmem [#allocation7], %s1854_s10 }
  0x79   : > { %1297 = vmatprep.subr.mxu0 %v1615_v0  ;;  %1299 = vmatprep.mubr.msk.f32.mxu0 %vm1616_vm0, %v1615_v0  ;;  %v318_v2 = vld [vmem:[%s1858_s22] sm:$0xff]  ;;  %v1257_v32 = vld [vmem:[%s1866_s9 + $0x8] sm:$0xff]  ;;  %v1263_v34 = vld [vmem:[%s1866_s9 + $0x10] sm:$0xff]  ;;  %s1617_s24 = smov 8   ;;  %s1618_s16 = smov 16  }
  0x7a   : > { %1302 = vmatprep.subr.mxu1 %v1615_v0  ;;  %1304 = vmatprep.mubr.msk.f32.mxu1 %vm1616_vm0, %v1615_v0  ;;  %v309_v4 = vshrl.u32 %v308_v3, 7  ;;  %v313_v5 = vand.u32 127, %v308_v3  ;;  %v320_v28 = vld [vmem:[%s1905_s18] sm:$0xff]  ;;  %v1256_v33 = vld [vmem:[%s1858_s22 + $0x8] sm:$0xff]  ;;  %v1262_v35 = vld [vmem:[%s1858_s22 + $0x10] sm:$0xff]  ;;  %s1619_s20 = smov 24  }
  0x7b   : > { %1298 = vmatpush3.xpose.msk.msra.mxu0 %vm321_vm1, %v319_v1  ;;  %1303 = vmatpush3.msra.mxu1 %v320_v28  ;;  %v1269_v36 = vld [vmem:[%s1866_s9 + $0x18] sm:$0xff]  ;;  %s1252_s5 = sshll.u32 %s1851_s21, 3  ;;  %s1275_s7 = sshll.u32 %s1600_s15, 7 }
  0x7c   : > { %1312 = vmatprep.subr.mxu0 %v1615_v0  ;;  %vm1885_vm2 = vcmp.le.s32.totalorder %v313_v5, %v309_v4  ;;  %vm315_vm5 = vcmp.lt.s32.totalorder %v309_v4, 3  ;;  %vm316_vm6 = vcmp.lt.s32.totalorder %v313_v5, 3  ;;  %1307 = vmatprep.subr.mxu1 %v1615_v0  ;;  %v1268_v37 = vld [vmem:[%s1858_s22 + $0x18] sm:$0xff]  ;;  %s303_s30 = scalar_lea.vmem [#allocation8], %s1252_s5  ;;  %s1984_s1 = scalar_lea.hbm %s2036_s3, %s1275_s7 }
  0x7d   : > { %vm1894_vm8 = vmand %vm315_vm5, %vm316_vm6  ;;  %s1099_s6 = sshll.u32 %s303_s30, 4  ;;  %s1084_s15 = scalar_lea.sflag [#allocation4], %s1851_s21  ;;  %s1986_s6 = int_to_ptr.vmem [resolvable:$true] %s1099_s6 }
  0x7e   : > { %1300 = vmatmul.mubr.msk.f32.vlgmr.msra.gmra.mrb[0].mxu0 %vm321_vm1, %v318_v2  ;;  %s1522_s28 = scalar_lea.vmem %s1986_s6, 128  ;;  %p2069_p10 = scmp.ne.s32.totalorder %s2051_s25, 0 }
  0x7f   : > { %1314 = vmatprep.mubr.msk.f32.mxu0 %vm1616_vm0, %v1615_v0  ;;  %p1523_p0 = scmp.ne.s32.totalorder %s1986_s6, %s1522_s28  ;;  %s1620_s29 = smov [#allocation8]  }
  0x80   : > { %s1526_s23 = sshll.u32 %s1620_s29, 4  ;;  %s1527_s23 = int_to_ptr.vmem [resolvable:$false] %s1526_s23 }
  0x81   : > { %p1524_p8 = pnand %p1523_p0, %p2069_p10  ;;  %s1528_s10 = scalar_lea.vmem %s1527_s23, 256 }
  0x82   : > { %p1529_p12 = scmp.lt.s32.totalorder %s1986_s6, %s1527_s23  ;;  %p1530_p1 = scmp.lt.s32.totalorder %s1528_s10, %s1522_s28 }
  0x83   : > { %p1525_p9 = pneg %p1524_p8 }
  0x84   : > { %p1531_p6 = por %p1530_p1, %p1529_p12 }
  0x86   : > { %p1532_p13 = pnand %p1531_p6, %p1525_p9 }
 0x151   : > { %v394_v7 = vpop.f32.mrb[0].mxu0 }
 0x152   : > { %v398_v8 = vmul.f32 0.35355338, %v394_v7  ;;  %v1301_v9 = vpop.f32.mrb[1].mxu0 }
 0x154   : > { %v399_v10 = vsel %vm1885_vm2, %v398_v8, -inf }
 0x155   : > { %v400_v11 = vsel %vm321_vm1, %v399_v10, -inf }
 0x156   : > { %401 = vmax.xlane.f32.xlu0 %v400_v11 }
 0x1e3   : > { %v402_v12 = vpop.xlane.xlu0 %401 }
 0x1e4   : > { %vm403_vm3 = vcmp.eq.f32.partialorder %v399_v10, %v402_v12 }
 0x1e5   : > { %v404_v13 = vsel %vm403_vm3, -inf, %v399_v10 }
 0x1e6   : > { %v405_v14 = vsel %vm321_vm1, %v404_v13, -inf }
 0x1e7   : > { %406 = vmax.xlane.f32.xlu0 %v405_v14 }
 0x274   : > { %v407_v15 = vpop.xlane.xlu0 %406 }
 0x275   : > { %vm408_vm4 = vcmp.eq.f32.partialorder %v404_v13, %v407_v15 }
 0x276   : > { %v409_v16 = vsel %vm408_vm4, -inf, %v404_v13 }
 0x277   : > { %v410_v17 = vsel %vm321_vm1, %v409_v16, -inf }
 0x278   : > { %411 = vmax.xlane.f32.xlu1 %v410_v17 }
 0x305   : > { %v412_v18 = vpop.xlane.xlu1 %411 }
 0x306   : > { %vm413_vm7 = vcmp.eq.f32.partialorder %v409_v16, %v412_v18 }
 0x307   : > { %v414_v19 = vsel %vm413_vm7, -inf, %v409_v16 }
 0x308   : > { %vm415_vm9 = vcmp.eq.f32.partialorder %v414_v19, -inf }
 0x309   : > { %vm416_vm10 = vmand %vm415_vm9, %vm1885_vm2 }
 0x30a   : > { %vm417_vm11 = vmor %vm416_vm10, %vm1894_vm8 }
 0x30b   : > { %v418_v21 = vsel %vm417_vm11, %v399_v10, 0.0 }
 0x30c   : > { %v419_v22 = vsel %vm321_vm1, %v418_v21, -inf }
 0x30d   : > { %420 = vmax.xlane.f32.xlu1 %v419_v22 }
 0x39a   : > { %v421_v23 = vpop.xlane.xlu1 %420 }
 0x39b   : > { %v422_v24 = vsub.f32 %v418_v21, %v421_v23 }
 0x39d   : > { %v423_v25 = vmul.f32 1.442695, %v422_v24 }
 0x39f   : > { %1416 = vpow2.f32 %v423_v25 }
 0x3a9   : > { %v1417_v26 = vpop.eup %1416 }
 0x3aa   : > { %v425_v27 = vsel %vm321_vm1, %v1417_v26, 0.0 }
 0x3ab   : > { %426 = vadd.xlane.f32.xlu0 %v425_v27 }
 0x438   : > { %v427_v29 = vpop.xlane.xlu0 %426 }
 0x439   : > { %1418 = vrcp.f32 %v427_v29 }
 0x443   : > { %v1419_v30 = vpop.eup %1418 }
 0x444   : > { %v429_v31 = vmul.f32 %v1419_v30, %v1417_v26 }
 0x446   : > { %1305 = vmatmul.mubr.msk.f32.vlgmr.msra.gmra.mrb[0].mxu1 %vm321_vm1, %v429_v31 }
 0x447   : > { %1308 = vmatpush3.xpose.msk.msra.mxu1 %vm321_vm1, %v1257_v32  ;;  %1309 = vmatprep.mubr.msk.f32.mxu1 %vm1616_vm0, %v1615_v0 }
 0x448   : > { %1317 = vmatprep.subr.mxu1 %v1615_v0 }
 0x44a   : > { %1310 = vmatmul.mubr.msk.f32.vlgmr.msra.gmra.mrb[2].mxu1 %vm321_vm1, %v1256_v33 }
 0x44b   : > { %1318 = vmatpush3.xpose.msk.msra.mxu1 %vm321_vm1, %v1263_v34  ;;  %1319 = vmatprep.mubr.msk.f32.mxu1 %vm1616_vm0, %v1615_v0 }
 0x44c   : > { %1327 = vmatprep.subr.mxu1 %v1615_v0 }
 0x44e   : > { %1320 = vmatmul.mubr.msk.f32.vlgmr.msra.gmra.mrb[4].mxu1 %vm321_vm1, %v1262_v35 }
 0x44f   : > { %1328 = vmatpush3.xpose.msk.msra.mxu1 %vm321_vm1, %v1269_v36  ;;  %1329 = vmatprep.mubr.msk.f32.mxu1 %vm1616_vm0, %v1615_v0 }
 0x452   : > { %1330 = vmatmul.mubr.msk.f32.vlgmr.msra.gmra.mrb[6].mxu1 %vm321_vm1, %v1268_v37  ;;  %v1258_v37 = vld [vmem:[%s1905_s18 + $0x8] sm:$0xff] }
 0x453   : > { %1313 = vmatpush3.msra.mxu0 %v1258_v37 }
 0x454   : > { %1322 = vmatprep.subr.mxu0 %v1615_v0 }
 0x519   : > { %v1930_v38 = vpop.f32.mrb[0].mxu1 }
 0x51a   : > { %v1306_v39 = vpop.f32.mrb[1].mxu1 }
 0x51d   : > { %v581_v40 = vpop.f32.mrb[2].mxu1 }
 0x51e   : > { %v585_v41 = vmul.f32 0.35355338, %v581_v40  ;;  %v1311_v42 = vpop.f32.mrb[3].mxu1 }
 0x520   : > { %v586_v43 = vsel %vm1885_vm2, %v585_v41, -inf }
 0x521   : > { %v768_v44 = vpop.f32.mrb[4].mxu1  ;;  %v587_v45 = vsel %vm321_vm1, %v586_v43, -inf }
 0x522   : > { %v772_v46 = vmul.f32 0.35355338, %v768_v44  ;;  %588 = vmax.xlane.f32.xlu1 %v587_v45  ;;  %v1321_v47 = vpop.f32.mrb[5].mxu1  ;;  %v1264_v44 = vld [vmem:[%s1905_s18 + $0x10] sm:$0xff] }
 0x523   : > { %v1270_v47 = vld [vmem:[%s1905_s18 + $0x18] sm:$0xff] }
 0x524   : > { %v773_v48 = vsel %vm1885_vm2, %v772_v46, -inf }
 0x525   : > { %v955_v49 = vpop.f32.mrb[6].mxu1  ;;  %v774_v50 = vsel %vm321_vm1, %v773_v48, -inf }
 0x526   : > { %v959_v51 = vmul.f32 0.35355338, %v955_v49  ;;  %775 = vmax.xlane.f32.xlu0 %v774_v50  ;;  %v1331_v52 = vpop.f32.mrb[7].mxu1 }
 0x528   : > { %v960_v53 = vsel %vm1885_vm2, %v959_v51, -inf }
 0x529   : > { %v961_v54 = vsel %vm321_vm1, %v960_v53, -inf }
 0x52a   : > { %962 = vmax.xlane.f32.xlu1 %v961_v54 }
 0x5af   : > { %v589_v55 = vpop.xlane.xlu1 %588 }
 0x5b0   : > { %vm590_vm12 = vcmp.eq.f32.partialorder %v586_v43, %v589_v55 }
 0x5b1   : > { %v591_v56 = vsel %vm590_vm12, -inf, %v586_v43 }
 0x5b2   : > { %v592_v57 = vsel %vm321_vm1, %v591_v56, -inf }
 0x5b3   : > { %593 = vmax.xlane.f32.xlu0 %v592_v57  ;;  %v776_v58 = vpop.xlane.xlu0 %775 }
 0x5b4   : > { %vm777_vm13 = vcmp.eq.f32.partialorder %v773_v48, %v776_v58 }
 0x5b5   : > { %v778_v59 = vsel %vm777_vm13, -inf, %v773_v48 }
 0x5b6   : > { %v779_v60 = vsel %vm321_vm1, %v778_v59, -inf }
 0x5b7   : > { %780 = vmax.xlane.f32.xlu1 %v779_v60  ;;  %v963_v61 = vpop.xlane.xlu1 %962 }
 0x5b8   : > { %vm964_vm14 = vcmp.eq.f32.partialorder %v960_v53, %v963_v61 }
 0x5b9   : > { %v965_v62 = vsel %vm964_vm14, -inf, %v960_v53 }
 0x5ba   : > { %v966_v63 = vsel %vm321_vm1, %v965_v62, -inf }
 0x5bb   : > { %967 = vmax.xlane.f32.xlu0 %v966_v63 }
 0x640   : > { %v594_v1 = vpop.xlane.xlu0 %593 }
 0x641   : > { %vm595_vm15 = vcmp.eq.f32.partialorder %v591_v56, %v594_v1 }
 0x642   : > { %v596_v2 = vsel %vm595_vm15, -inf, %v591_v56 }
 0x643   : > { %v597_v3 = vsel %vm321_vm1, %v596_v2, -inf }
 0x644   : > { %598 = vmax.xlane.f32.xlu1 %v597_v3  ;;  %v781_v4 = vpop.xlane.xlu1 %780 }
 0x645   : > { %vm782_vm3 = vcmp.eq.f32.partialorder %v778_v59, %v781_v4 }
 0x646   : > { %v783_v5 = vsel %vm782_vm3, -inf, %v778_v59 }
 0x647   : > { %v784_v7 = vsel %vm321_vm1, %v783_v5, -inf }
 0x648   : > { %v968_v8 = vpop.xlane.xlu0 %967  ;;  %785 = vmax.xlane.f32.xlu0 %v784_v7 }
 0x649   : > { %vm969_vm4 = vcmp.eq.f32.partialorder %v965_v62, %v968_v8 }
 0x64a   : > { %v970_v9 = vsel %vm969_vm4, -inf, %v965_v62 }
 0x64b   : > { %v971_v10 = vsel %vm321_vm1, %v970_v9, -inf }
 0x64c   : > { %972 = vmax.xlane.f32.xlu1 %v971_v10 }
 0x6d1   : > { %v599_v11 = vpop.xlane.xlu1 %598 }
 0x6d2   : > { %vm600_vm5 = vcmp.eq.f32.partialorder %v596_v2, %v599_v11 }
 0x6d3   : > { %v601_v12 = vsel %vm600_vm5, -inf, %v596_v2 }
 0x6d4   : > { %vm602_vm6 = vcmp.eq.f32.partialorder %v601_v12, -inf }
 0x6d5   : > { %vm603_vm7 = vmand %vm602_vm6, %vm1885_vm2  ;;  %v786_v13 = vpop.xlane.xlu0 %785 }
 0x6d6   : > { %vm787_vm9 = vcmp.eq.f32.partialorder %v783_v5, %v786_v13  ;;  %vm604_vm10 = vmor %vm603_vm7, %vm1894_vm8 }
 0x6d7   : > { %v788_v14 = vsel %vm787_vm9, -inf, %v783_v5  ;;  %v605_v15 = vsel %vm604_vm10, %v586_v43, 0.0 }
 0x6d8   : > { %vm789_vm11 = vcmp.eq.f32.partialorder %v788_v14, -inf  ;;  %v606_v16 = vsel %vm321_vm1, %v605_v15, -inf }
 0x6d9   : > { %vm790_vm12 = vmand %vm789_vm11, %vm1885_vm2  ;;  %607 = vmax.xlane.f32.xlu0 %v606_v16  ;;  %v973_v17 = vpop.xlane.xlu1 %972 }
 0x6da   : > { %vm974_vm13 = vcmp.eq.f32.partialorder %v970_v9, %v973_v17  ;;  %vm791_vm14 = vmor %vm790_vm12, %vm1894_vm8 }
 0x6db   : > { %v975_v18 = vsel %vm974_vm13, -inf, %v970_v9  ;;  %v792_v19 = vsel %vm791_vm14, %v773_v48, 0.0 }
 0x6dc   : > { %vm976_vm15 = vcmp.eq.f32.partialorder %v975_v18, -inf  ;;  %v793_v21 = vsel %vm321_vm1, %v792_v19, -inf }
 0x6dd   : > { %vm977_vm3 = vmand %vm976_vm15, %vm1885_vm2  ;;  %794 = vmax.xlane.f32.xlu1 %v793_v21  ;;  %vm1079_vm2 = vcmask 195584  }
 0x6de   : > { %vm978_vm4 = vmor %vm977_vm3, %vm1894_vm8  ;;  %vm1081_vm8 = vcmask 261120  }
 0x6df   : > { %v979_v22 = vsel %vm978_vm4, %v960_v53, 0.0 }
 0x6e0   : > { %v980_v23 = vsel %vm321_vm1, %v979_v22, -inf }
 0x6e1   : > { %981 = vmax.xlane.f32.xlu0 %v980_v23 }
 0x766   : > { %v608_v24 = vpop.xlane.xlu0 %607 }
 0x767   : > { %v609_v25 = vsub.f32 %v605_v15, %v608_v24 }
 0x769   : > { %v610_v26 = vmul.f32 1.442695, %v609_v25 }
 0x76a   : > { %v795_v27 = vpop.xlane.xlu1 %794 }
 0x76b   : > { %1420 = vpow2.f32 %v610_v26  ;;  %v796_v28 = vsub.f32 %v792_v19, %v795_v27 }
 0x76d   : > { %v797_v29 = vmul.f32 1.442695, %v796_v28 }
 0x76e   : > { %v982_v30 = vpop.xlane.xlu0 %981 }
 0x76f   : > { %1422 = vpow2.f32 %v797_v29  ;;  %v983_v6 = vsub.f32 %v979_v22, %v982_v30 }
 0x771   : > { %v984_v31 = vmul.f32 1.442695, %v983_v6 }
 0x773   : > { %1424 = vpow2.f32 %v984_v31 }
 0x775   : > { %v1421_v32 = vpop.eup %1420 }
 0x776   : > { %v612_v20 = vsel %vm321_vm1, %v1421_v32, 0.0 }
 0x777   : > { %613 = vadd.xlane.f32.xlu1 %v612_v20 }
 0x779   : > { %v1423_v33 = vpop.eup %1422 }
 0x77a   : > { %v799_v34 = vsel %vm321_vm1, %v1423_v33, 0.0 }
 0x77b   : > { %800 = vadd.xlane.f32.xlu0 %v799_v34 }
 0x77d   : > { %v1425_v35 = vpop.eup %1424 }
 0x77e   : > { %v986_v36 = vsel %vm321_vm1, %v1425_v35, 0.0 }
 0x77f   : > { %987 = vadd.xlane.f32.xlu1 %v986_v36 }
 0x804   : > { %v614_v39 = vpop.xlane.xlu1 %613 }
 0x805   : > { %1426 = vrcp.f32 %v614_v39 }
 0x808   : > { %v801_v40 = vpop.xlane.xlu0 %800 }
 0x809   : > { %1428 = vrcp.f32 %v801_v40 }
 0x80c   : > { %v988_v41 = vpop.xlane.xlu1 %987 }
 0x80d   : > { %1430 = vrcp.f32 %v988_v41 }
 0x80f   : > { %v1427_v42 = vpop.eup %1426 }
 0x810   : > { %v616_v43 = vmul.f32 %v1427_v42, %v1421_v32 }
 0x812   : > { %1315 = vmatmul.mubr.msk.f32.vlgmr.msra.gmra.mrb[2].mxu0 %vm321_vm1, %v616_v43 }
 0x813   : > { %v1429_v45 = vpop.eup %1428  ;;  %1323 = vmatpush3.msra.mxu0 %v1264_v44  ;;  %1324 = vmatprep.mubr.msk.f32.mxu0 %vm1616_vm0, %v1615_v0 }
 0x814   : > { %v803_v46 = vmul.f32 %v1429_v45, %v1423_v33  ;;  %1332 = vmatprep.subr.mxu0 %v1615_v0 }
 0x816   : > { %1325 = vmatmul.mubr.msk.f32.vlgmr.msra.gmra.mrb[4].mxu0 %vm321_vm1, %v803_v46 }
 0x817   : > { %v1431_v48 = vpop.eup %1430  ;;  %1333 = vmatpush3.msra.mxu0 %v1270_v47  ;;  %1334 = vmatprep.mubr.msk.f32.mxu0 %vm1616_vm0, %v1615_v0  ;;  %vm1077_vm0 = vcmask 130048  }
 0x818   : > { %v990_v49 = vmul.f32 %v1431_v48, %v1425_v35 }
 0x81a   : > { %1335 = vmatmul.mubr.msk.f32.vlgmr.msra.gmra.mrb[6].mxu0 %vm321_vm1, %v990_v49 }
 0x8e5   : > { %v686_v50 = vpop.f32.mrb[2].mxu0 }
 0x8e6   : > { %1065 = vrot.lane.b32.xlu0 %v686_v50, %s1617_s24  ;;  %v1316_v51 = vpop.f32.mrb[3].mxu0 }
 0x8e9   : > { %v873_v52 = vpop.f32.mrb[4].mxu0 }
 0x8ea   : > { %1069 = vrot.lane.b32.xlu1 %v873_v52, %s1618_s16  ;;  %v1326_v53 = vpop.f32.mrb[5].mxu0 }
 0x8ed   : > { %v1060_v54 = vpop.f32.mrb[6].mxu0 }
 0x8ee   : > { %1073 = vrot.lane.b32.xlu1 %v1060_v54, %s1619_s20  ;;  %v1336_v55 = vpop.f32.mrb[7].mxu0 }
 0x958   : > { %v1066_v56 = vpop.permute.xlu0 %1065 }
 0x959   : > { %v1076_v57 = vsel %vm321_vm1, %v1930_v38, %v1066_v56 }
 0x95c   : > { %v1070_v0 = vpop.permute.xlu1 %1069 }
 0x95d   : > { %v1078_v58 = vsel %vm1077_vm0, %v1076_v57, %v1070_v0 }
 0x960   : > { %v1074_v59 = vpop.permute.xlu1 %1073 }
 0x961   : > { %v1080_v60 = vsel %vm1079_vm2, %v1078_v58, %v1074_v59 }
 0x962   : > { %1082 = vst.msk [vmem:[%s303_s30] sm:$0xff] %vm1081_vm8, %v1080_v60 }
 0x963   : > { %1535 = shalt.err (!%p1532_p13)
}
 0x964   : > { %s1536_s21 = scalar_lea.hbm %s1984_s1, 128  ;;  %s1540_s11 = scalar_lea.hbm %s2036_s3, 256 }
 0x965   : > { %p1537_p11 = scmp.ne.s32.totalorder %s1984_s1, %s1536_s21  ;;  %p1541_p7 = scmp.lt.u32.totalorder %s1984_s1, %s2036_s3 }
 0x966   : > { %p1542_p4 = scmp.lt.u32.totalorder %s1540_s11, %s1536_s21  ;;  %p1544_p0 = scmp.lt.u32.totalorder %s1536_s21, %s1984_s1 }
 0x967   : > { %p1538_p2 = pnand %p1537_p11, %p2069_p10 }
 0x968   : > { %p1543_p3 = por %p1542_p4, %p1541_p7 }
 0x969   : > { %p1539_p5 = pneg %p1538_p2 }
 0x96a   : > { %p1545_p8 = por %p1544_p0, %p1543_p3 }
 0x96c   : > { %p1546_p9 = pnand %p1545_p8, %p1539_p5 }
 0x96e   : > { %1549 = shalt.err (!%p1546_p9)
}
 0x96f   : > { %1343 = dma.vmem_to_hbm [thread:$0]  (%p2069_p10), %s1986_s6, 128, %s1984_s1, %s1084_s15  }
 0x970 PF: > { %s1111_s18 = sand.u32 1, %s1588_s12   ;;  %p2070_p12 = scmp.ne.s32.totalorder %s2053_s27, 0 }
 0x971   : > { %p2071_p1 = scmp.ge.s32.totalorder %s1608_s17, 2  ;;  %s1112_s24 = scalar_lea.sflag [#allocation4], %s1111_s18 }
 0x973   : > { %p1356_p6 = pnand %p2071_p1, %p2070_p12 }
 0x975   : > { %1583 = dma.done.wait (!%p1356_p6), %s1112_s24, 128  }
 0x976   : > { %1585 = vsyncadd (!%p1356_p6), %s1112_s24, 4294967168  ;;  %s22_s17 = sadd.s32 1, %s1608_s17   ;;  %s2072_s25 = sld [smem:[#allocation14_spill]] }
 0x977   : > { %p19_p13 = scmp.ge.s32.totalorder %s22_s17, 4   ;;  %s2073_s15 = sld [smem:[#allocation12_spill]] }
 0x978   : > { %s2074_s16 = sld [smem:[#allocation13_spill]]  ;;  %s2075_s12 = smov %s1592_s13 }
 0x979   : > { %s2076_s13 = smov %s1596_s14  ;;  %21 = sbr.rel (!%p19_p13) target bundleno = 10 (0xa), region = 110 }
 0x97c   : > { %s2077_s14 = smov %s2072_s25 }
 0x980   :  { %1117 = vsyncpa [#allocation3], 1 }
 0x981   :  { %1119 = vsyncpa [#allocation3 + $0x1], 1 }
 0x982   :  { %1120 = vsyncpa [#allocation6], 1 }
 0x983   :  { %1122 = vsyncpa [#allocation6 + $0x1], 1 }
 0x984   :  { %1123 = vsyncpa [#allocation4], 1 }
 0x985   :  { %1125 = vsyncpa [#allocation4 + $0x1], 1 }

</bundles_post_ra>
